<compile_context>
chip_gen: v6e
topology: v6e:2x2x1
jax: 0.10.0
libtpu: 0.0.40
codegen_flags: <defaults>
</compile_context>

<pallas_src>
import functools

import jax
import jax.numpy as jnp
from jax.experimental import pallas as pl
from jax.experimental.pallas import tpu as pltpu


def _round_up(n, m):
    return ((n + m - 1) // m) * m


def _linear_kernel(x_ref, w_ref, b_ref, o_ref):
    # x_ref: (tm, D)  w_ref: (D, C)  b_ref: (1, C)  o_ref: (tm, C)
    acc = jnp.dot(x_ref[...], w_ref[...], preferred_element_type=jnp.float32)
    o_ref[...] = (acc + b_ref[...]).astype(o_ref.dtype)


def linear_head_pallas(x_tokens, weight, bias, *, tm=1024):
    """Dense head: (M, D) @ (D, C) + (C,) -> (M, C), tiled over rows only.

    No HBM-side padding: x / weight / bias / output keep their natural shapes;
    the full-extent D and C block dims are padded internally by Mosaic.
    """
    M, D = x_tokens.shape
    C = weight.shape[1]
    out_dtype = x_tokens.dtype

    xb = jnp.dtype(x_tokens.dtype).itemsize
    wb = jnp.dtype(weight.dtype).itemsize
    ob = jnp.dtype(out_dtype).itemsize

    # Row tile: multiple of 8, at most ~M/2 so grid_m >= 2 (keeps both v7x
    # TensorCores busy under dimension_semantics=("parallel",)).
    half_m = max(8, _round_up(pl.cdiv(M, 2), 8))
    tm_eff = max(8, min(_round_up(tm, 8), half_m))

    # VMEM estimate: x + out double-buffered, weight + bias single-buffered.
    def _vmem_est(t):
        return (2 * t * D * xb          # x tiles (double buffered)
                + 2 * t * C * ob        # output tiles (double buffered)
                + D * C * wb            # weight (single buffered)
                + 8 * 128 * 4)          # bias tile (internal (8,128) pad)

    VMEM_BUDGET = 24 * 1024 * 1024      # per-core safe on v5e / v6e / v7x
    while tm_eff > 8 and _vmem_est(tm_eff) > VMEM_BUDGET:
        tm_eff = max(8, _round_up(tm_eff // 2, 8))
    vmem_est = _vmem_est(tm_eff)

    grid_m = pl.cdiv(M, tm_eff)

    compiler_kwargs = {}
    if vmem_est > 12 * 1024 * 1024:
        # Above v5e's ~16 MiB scoped default: request the budget explicitly
        # (well within 64 MiB physical on v7x and 128 MiB on v5e/v6e).
        compiler_kwargs["vmem_limit_bytes"] = min(
            vmem_est + (2 << 20), 30 * 1024 * 1024)

    b2 = bias.reshape(1, C).astype(jnp.float32)

    y = pl.pallas_call(
        _linear_kernel,
        out_shape=jax.ShapeDtypeStruct((M, C), out_dtype),
        grid_spec=pltpu.PrefetchScalarGridSpec(
            num_scalar_prefetch=0,
            grid=(grid_m,),
            in_specs=[
                # x row tile: full-D block, pipelined (double buffered).
                pl.BlockSpec((tm_eff, D), lambda i: (i, 0)),
                # Full weight, constant index -> single buffer is enough.
                pl.BlockSpec((D, C), lambda i: (0, 0),
                             pipeline_mode=pl.Buffered(1)),
                # Bias row, constant index -> single buffer.
                pl.BlockSpec((1, C), lambda i: (0, 0),
                             pipeline_mode=pl.Buffered(1)),
            ],
            out_specs=pl.BlockSpec((tm_eff, C), lambda i: (i, 0)),
        ),
        compiler_params=pltpu.CompilerParams(
            # Single row axis; "parallel" lets v7x shard it across both TCs.
            dimension_semantics=("parallel",),
            **compiler_kwargs,
        ),
    )(x_tokens, weight, b2)

    return y


def decoder_linear_forward(x, image_size, patch_size, weight, bias, *, tm=1024):
    """x: (B, N, D) tokens.  Returns (B, n_cls, h, w) NCHW, matching PyTorch."""
    B, N, D = x.shape
    H, W = image_size
    h = H // patch_size
    w = N // h
    assert h * w == N, "token count must equal (H/ps)*(W/ps)"
    C = weight.shape[1]

    x_flat = x.reshape(B * N, D)
    y_flat = linear_head_pallas(x_flat, weight, bias, tm=tm)

    # Single fused relayout pass on the small, unpadded output.
    # TODO(synk): skip the NCHW transpose entirely if downstream accepts NHWC.
    y = jnp.transpose(y_flat.reshape(B, h, w, C), (0, 3, 1, 2))
    return y


if __name__ == "__main__":
    # Small, module-consistent shapes.
    number_of_colors = 8          # n_cls
    patch_size = 4
    decoder_encoder = 32          # hidden dim D
    B = 2
    H = W = 16
    h = H // patch_size
    N = h * (W // patch_size)     # 16 tokens

    key = jax.random.PRNGKey(0)
    kx, kw, kb = jax.random.split(key, 3)

    x = jax.random.normal(kx, (B, N, decoder_encoder), dtype=jnp.float32)
    # Deterministic synthetic params (shapes from nn.Linear(D, n_cls)).
    weight = 0.02 * jax.random.normal(
        kw, (decoder_encoder, number_of_colors), dtype=jnp.float32)
    bias = 0.01 * jax.random.normal(kb, (number_of_colors,), dtype=jnp.float32)

    fwd = jax.jit(functools.partial(
        decoder_linear_forward, image_size=(H, W), patch_size=patch_size))
    out = fwd(x, weight=weight, bias=bias)
    out = jax.block_until_ready(out)

    # Reference check in plain JAX.
    ref = jnp.einsum("bnd,dc->bnc", x, weight) + bias
    ref = jnp.transpose(
        ref.reshape(B, h, N // h, number_of_colors), (0, 3, 1, 2))
    assert out.shape == (B, number_of_colors, h, W // patch_size)
    assert jnp.allclose(out, ref, atol=1e-5, rtol=1e-5)

    print("KERNEL_OK")
</pallas_src>

<mosaic_0001>
module attributes {stable_mosaic.version = 11 : i64} {
  func.func @_linear_kernel(%arg0: i32, %arg1: memref<16x32xf32, #tpu.memory_space<vmem>>, %arg2: memref<32x8xf32, #tpu.memory_space<vmem>>, %arg3: memref<1x8xf32, #tpu.memory_space<vmem>>, %arg4: memref<16x8xf32, #tpu.memory_space<vmem>>) attributes {dimension_semantics = [#tpu.dimension_semantics<parallel>], iteration_bounds = array<i64: 2>, scalar_prefetch = 0 : i64, scratch_operands = 0 : i64, tpu.core_type = #tpu.core_type<tc>, window_params = [{transform_indices = @transform_0, window_bounds = array<i64: 16, 32>}, {pipeline_mode = #tpu.pipeline_mode<synchronous>, transform_indices = @transform_1, window_bounds = array<i64: 32, 8>}, {pipeline_mode = #tpu.pipeline_mode<synchronous>, transform_indices = @transform_2, window_bounds = array<i64: 1, 8>}, {transform_indices = @transform_3, window_bounds = array<i64: 16, 8>}]} {
    %c0 = arith.constant 0 : index
    %c0_0 = arith.constant 0 : index
    %0 = vector.load %arg1[%c0, %c0_0] : memref<16x32xf32, #tpu.memory_space<vmem>>, vector<16x32xf32>
    %c0_1 = arith.constant 0 : index
    %c0_2 = arith.constant 0 : index
    %1 = vector.load %arg2[%c0_1, %c0_2] : memref<32x8xf32, #tpu.memory_space<vmem>>, vector<32x8xf32>
    %cst = arith.constant dense<0.000000e+00> : vector<16x8xf32>
    %2 = tpu.matmul %0, %1, %cst {dimension_numbers = #tpu.dot_dimension_numbers<[1], [0], [0], [1], [0, 0, 1, 1], [], []>} : vector<16x32xf32>, vector<32x8xf32>, vector<16x8xf32> -> vector<16x8xf32>
    %c0_3 = arith.constant 0 : index
    %c0_4 = arith.constant 0 : index
    %3 = vector.load %arg3[%c0_3, %c0_4] : memref<1x8xf32, #tpu.memory_space<vmem>>, vector<1x8xf32>
    %4 = vector.broadcast %3 : vector<1x8xf32> to vector<16x8xf32>
    %5 = arith.addf %2, %4 : vector<16x8xf32>
    %c0_5 = arith.constant 0 : index
    %c0_6 = arith.constant 0 : index
    %6 = vector.load %arg4[%c0_5, %c0_6] : memref<16x8xf32, #tpu.memory_space<vmem>>, vector<16x8xf32>
    tpu.vector_store %arg4[%c0_5, %c0_6], %5 {strides = array<i32>} : memref<16x8xf32, #tpu.memory_space<vmem>>, vector<16x8xf32>,
    return
  }
  func.func @transform_0(%arg0: i32) -> (i32, i32) {
    %c0_i32 = arith.constant 0 : i32
    %c0_i32_0 = arith.constant 0 : i32
    return %arg0, %c0_i32 : i32, i32
  }
  func.func @transform_1(%arg0: i32) -> (i32, i32) {
    %c0_i32 = arith.constant 0 : i32
    %c0_i32_0 = arith.constant 0 : i32
    %c0_i32_1 = arith.constant 0 : i32
    return %c0_i32, %c0_i32_0 : i32, i32
  }
  func.func @transform_2(%arg0: i32) -> (i32, i32) {
    %c0_i32 = arith.constant 0 : i32
    %c0_i32_0 = arith.constant 0 : i32
    %c0_i32_1 = arith.constant 0 : i32
    return %c0_i32, %c0_i32_0 : i32, i32
  }
  func.func @transform_3(%arg0: i32) -> (i32, i32) {
    %c0_i32 = arith.constant 0 : i32
    %c0_i32_0 = arith.constant 0 : i32
    return %arg0, %c0_i32 : i32, i32
  }
}

</mosaic_0001>

<bundles_post_ra>
// kernel: decoder_linear_forward.1
= control target key start
LH: loop header
LB: loop body
LE: loop exit
PB: predicated region body
PF: predicated region fallthrough
CT: control target
= control target key end

     0   :  { %8 = vsyncpa [#allocation3], 0  ;;  %s621_s0 = inlined_call_operand.vmem [shape: f32[32,32], index: 0, kind: input, shape index: {}]   ;;  %s622_s1 = inlined_call_operand.vmem [shape: f32[32,8], index: 1, kind: input, shape index: {}]   ;;  %s623_s2 = inlined_call_operand.vmem [shape: f32[1,8], index: 2, kind: input, shape index: {}]   ;;  %s624_s3 = inlined_call_operand.hbm [shape: f32[32,8], index: 3, kind: output, shape index: {}]  }
   0x1   :  { %10 = vsyncpa [#allocation3 + $0x1], 0  ;;  %s505_s12 = smov 0   ;;  %s507_s13 = smov 0  }
   0x2   :  { %s509_s14 = smov 0   ;;  %s511_s15 = smov 0  }
   0x3 LB: > { %s526_s16 = sadd.s32 4294967295, %s480_s15   ;;  %s346_s17 = sadd.s32 4294967294, %s480_s15   ;;  %s480_s15 = sphi %s511_s15, %s630_s15   ;;  %s476_s14 = sphi %s509_s14, %s629_s14   ;;  %s472_s13 = sphi %s507_s13, %s628_s13   ;;  %s468_s12 = sphi %s505_s12, %s627_s12  }
   0x4   : > { %s530_s18 = sadd.s32 1, %s480_s15   ;;  %s91_s19 = sadd.s32 1, %s476_s14 }
   0x5   : > { %s88_s20 = ssub.s32 %s480_s15, %s530_s18  ;;  %p101_p0 = scmp.ne.s32.totalorder %s476_s14, %s472_s13 }
   0x6   : > { %p89_p1 = scmp.eq.s32.totalorder %s88_s20, 0  ;;  %p102_p2 = scmp.eq.s32.totalorder %s526_s16, 1 }
   0x7   : > { %p107_p3 = scmp.ne.s32.totalorder %s472_s13, %s468_s12  ;;  %p108_p4 = scmp.eq.s32.totalorder %s346_s17, 1 }
   0x8   : > { %s541_s21 = scalar_select %p89_p1, %s476_s14, %s91_s19  }
   0x9   : > { %p543_p5 = por %p102_p2, %p101_p0  ;;  %p547_p6 = por %p108_p4, %p107_p3 }
   0xa   : > { %p349_p7 = scmp.ge.s32.totalorder %s480_s15, 1  ;;  %p141_p8 = scmp.lt.s32.totalorder %s480_s15, 3 }
   0xc   : > { %p142_p9 = pnand %p349_p7, %p141_p8 }
   0xd   : > { %s351_s28 = sshll.u32 (!%p142_p9), %s526_s16, 1  ;;  %s162_s10 = sand.u32 (!%p142_p9), 1, %s472_s13  }
   0xe   : > { %145 = sbr.rel (%p142_p9) target bundleno = 239 (0xef), region = 32  ;;  %p166_p10 = scmp.lt.s32.totalorder (!%p142_p9), %s351_s28, 3 }
   0xf   : > { %s350_s11 = sshll.u32 (!%p142_p9), %s162_s10, 4  ;;  %s361_s25 = sshll.u32 (!%p142_p9), %s526_s16, 8 }
  0x10   : > { %s164_s20 = scalar_lea.vmem (!%p142_p9), [#allocation2], %s350_s11  ;;  %s581_s29 = scalar_lea.sflag (!%p142_p9), [#allocation3], %s162_s10 }
  0x11   : > { %s284_s24 = sshll.u32 (!%p142_p9), %s164_s20, 4  ;;  %s482_s30 = smov (!%p142_p9), [#allocation2]   ;;  %s574_s24 = int_to_ptr.vmem [resolvable:$true] %s284_s24 }
  0x12   : > { %s420_s16 = scalar_lea.vmem (!%p142_p9), %s574_s24, 256  ;;  %s424_s4 = sshll.u32 (!%p142_p9), %s482_s30, 4  ;;  %s425_s4 = int_to_ptr.vmem [resolvable:$false] %s424_s4 }
  0x13   : > { %v177_v0 = vld [vmem:[%s622_s1 + $0x18] sm:$0xff]  ;;  %v176_v1 = vld [vmem:[%s622_s1 + $0x10] sm:$0xff]  ;;  %v175_v2 = vld [vmem:[%s622_s1 + $0x8] sm:$0xff]  ;;  %s632_s28 = smov (!%p166_p10, %s351_s28), 3  ;;  %vm185_vm0 = vcmask 261120   ;;  %vm267_vm1 = vcmask 64512   ;;  %p421_p11 = scmp.ne.s32.totalorder %s574_s24, %s420_s16 }
  0x14   : > { %368 = vmatprep.subr.mxu0 %v177_v0  ;;  %v174_v3 = vld [vmem:[%s622_s1] sm:$0xff]  ;;  %s352_s6 = sshll.u32 %s632_s28, 3  ;;  %s579_s28 = scalar_lea.hbm %s624_s3, %s361_s25 }
  0x15   : > { %369 = vmatpush3.msra.mxu0 %v177_v0  ;;  %s169_s9 = scalar_lea.vmem %s621_s0, %s352_s6  ;;  %v353_v6 = vld [vmem:[%s623_s2] ss:$0 sm:$0xff]  ;;  %p422_p12 = pnand %p421_p11, %p543_p5 }
  0x16   : > { %370 = vmatprep.subr.mxu0 %v176_v1  ;;  %v172_v4 = vld [vmem:[%s169_s9] sm:$0xff]  ;;  %v173_v5 = vld [vmem:[%s169_s9 + $0x8] sm:$0xff]  ;;  %s426_s5 = scalar_lea.vmem %s425_s4, 512  ;;  %p427_p0 = scmp.lt.s32.totalorder %s574_s24, %s425_s4 }
  0x17   : > { %371 = vmatpush3.msra.mxu0 %v176_v1  ;;  %376 = vmatprep.mubr.msk.f32.mxu0 %vm185_vm0, %v172_v4  ;;  %p423_p13 = pneg %p422_p12  ;;  %p428_p1 = scmp.lt.s32.totalorder %s426_s5, %s420_s16 }
  0x18   : > { %372 = vmatprep.subr.mxu0 %v175_v2 }
  0x19   : > { %373 = vmatpush3.msra.mxu0 %v175_v2  ;;  %p429_p2 = por %p428_p1, %p427_p0 }
  0x1a   : > { %374 = vmatprep.subr.mxu0 %v174_v3 }
  0x1b   : > { %375 = vmatpush3.msra.mxu0 %v174_v3  ;;  %p430_p3 = pnand %p429_p2, %p423_p13 }
  0x1c   : > { %377 = vmatmul.mubr.msk.f32.vlgmr.msra.gmra.mxu0 %vm185_vm0, %v173_v5 }
  0xdc   : > { %v378_v7 = vpop.f32.mrf.mxu0 }
  0xdd   : > { %v264_v8 = vadd.f32 %v378_v7, %v353_v6 }
  0xde   : > { %v258_v9 = vpop.f32.mrf.mxu0 }
  0xdf   : > { %269 = vst.msk [vmem:[%s164_s20 + $0x8] sm:$0xff] %vm267_vm1, %v264_v8  ;;  %v259_v10 = vadd.f32 %v353_v6, %v258_v9 }
  0xe1   : > { %268 = vst.msk [vmem:[%s164_s20] sm:$0xff] %vm267_vm1, %v259_v10 }
  0xe2   : > { %433 = shalt.err (!%p430_p3)
}
  0xe3   : > { %s434_s6 = scalar_lea.hbm %s579_s28, 256  ;;  %s438_s9 = scalar_lea.hbm %s624_s3, 512 }
  0xe4   : > { %p435_p4 = scmp.ne.s32.totalorder %s579_s28, %s434_s6  ;;  %p439_p9 = scmp.lt.s32.totalorder %s579_s28, %s624_s3 }
  0xe5   : > { %p440_p10 = scmp.lt.s32.totalorder %s438_s9, %s434_s6 }
  0xe6   : > { %p436_p7 = pnand %p435_p4, %p543_p5 }
  0xe7   : > { %p441_p11 = por %p440_p10, %p439_p9 }
  0xe8   : > { %p437_p8 = pneg %p436_p7 }
  0xea   : > { %p442_p12 = pnand %p441_p11, %p437_p8 }
  0xec   : > { %445 = shalt.err (!%p442_p12)
}
  0xed   : > { %s483_s17 = smov 128   ;;  %s484_s19 = smov 8  }
  0xee   : > { %379 = dma.vmem_to_hbm [thread:$0]  (%p543_p5), %s574_s24, 256, %s579_s28, %s581_s29, %s483_s17, %s483_s17, %s484_s19  }
  0xef PF: > { %p385_p13 = scmp.ge.s32.totalorder %s480_s15, 2  ;;  %s299_s20 = sand.u32 1, %s468_s12  }
  0xf0   : > { %s300_s25 = scalar_lea.sflag [#allocation3], %s299_s20 }
  0xf1   : > { %p382_p0 = pnand %p385_p13, %p547_p6 }
  0xf3   : > { %p383_p1 = pneg %p382_p0 }
  0xf5   : > { %463 = dma.done.wait (%p383_p1), %s300_s25, 256  }
  0xf6   : > { %465 = vsyncadd (%p383_p1), %s300_s25, 4294967040  ;;  %p13_p2 = scmp.ge.s32.totalorder %s530_s18, 4   ;;  %s627_s12 = smov %s472_s13 }
  0xf7   : > { %s628_s13 = smov %s476_s14  ;;  %s629_s14 = smov %s541_s21 }
  0xf8   : > { %s630_s15 = smov %s530_s18  ;;  %15 = sbr.rel (!%p13_p2) target bundleno = 3 (0x3), region = 67 }
  0xfd   :  { %305 = vsyncpa [#allocation3], 1 }
  0xfe   :  { %307 = vsyncpa [#allocation3 + $0x1], 1 }

</bundles_post_ra>
